<compile_context>
chip_gen: v7x
topology: tpu7x:2x2x1
jax: 0.10.0
libtpu: 0.0.40
codegen_flags: <defaults>
</compile_context>

<pallas_src>
import jax
import jax.numpy as jnp
from jax.experimental import pallas as pl
from jax.experimental.pallas import tpu as pltpu

DIVISION_EPS = 1e-10


def _make_miou_kernel(m_total, tile_m, steps_per_split, needs_mask, compute_dtype):
    """Kernel closed over static tiling parameters.

    Refs:
      e_ref   : (G, GK)        label -> lane broadcast matrix (0/1), compute_dtype
      cls_ref : (1, GK)        class id per lane (lane % K), f32
      w_ref   : (1, tile_m, GK) soft-weight tile
      l_ref   : (1, tile_m, G)  integer-label tile
      dot_out : (1, 1, 1, GK)  partial sum of onehot * W   (per split, batch)
      den_out : (1, 1, 1, GK)  partial sum of onehot + W   (per split, batch)
      dot_acc / den_acc : (1, GK) VMEM accumulators
    """

    def kernel(e_ref, cls_ref, w_ref, l_ref, dot_out, den_out, dot_acc, den_acc):
        m_idx = pl.program_id(2)

        @pl.when(m_idx == 0)
        def _init():
            dot_acc[...] = jnp.zeros_like(dot_acc)
            den_acc[...] = jnp.zeros_like(den_acc)

        w = w_ref[0].astype(jnp.float32)          # (tile_m, GK)
        lab = l_ref[0].astype(compute_dtype)      # (tile_m, G)

        def accumulate(w_t, lab_t):
            # Broadcast each group's label across its K class lanes via a tiny
            # constant 0/1 matmul (MXU, exact for small integers), then one VPU
            # compare gives the one-hot at full lane width.
            lab_x = jnp.dot(lab_t, e_ref[...], preferred_element_type=jnp.float32)
            onehot = (lab_x == cls_ref[...]).astype(jnp.float32)      # (tile_m, GK)
            dot_acc[...] += jnp.sum(onehot * w_t, axis=0, keepdims=True)
            den_acc[...] += jnp.sum(onehot + w_t, axis=0, keepdims=True)

        if needs_mask:
            # Only the ragged / overflow tiles pay for the mask (pl.when gate).
            blk = pl.program_id(0) * steps_per_split + m_idx
            is_full = (blk + 1) * tile_m <= m_total

            @pl.when(is_full)
            def _full():
                accumulate(w, lab)

            @pl.when(jnp.logical_not(is_full))
            def _ragged():
                rem = m_total - blk * tile_m      # may be <= 0 for overflow blocks
                row = jax.lax.broadcasted_iota(jnp.int32, (tile_m, 1), 0)
                valid = row < rem
                accumulate(jnp.where(valid, w, 0.0),
                           jnp.where(valid, lab, jnp.asarray(-1.0, compute_dtype)))
        else:
            accumulate(w, lab)

        @pl.when(m_idx == pl.num_programs(2) - 1)
        def _finalize():
            dot_out[...] = dot_acc[...].reshape(1, 1, 1, -1)
            den_out[...] = den_acc[...].reshape(1, 1, 1, -1)

    return kernel


def miou_loss(W, I_gt, matching_indices=None, *, max_tile_m=16384, core_split=None):
    """Pallas-backed MIoULoss.forward.

    W: (B, N, K) float, I_gt: (B, N) integer labels in [0, K).  Returns (B, K) f32.
    `matching_indices` is accepted and ignored (unused in the reference too).
    """
    W = jnp.asarray(W)
    I_gt = jnp.asarray(I_gt)
    B, N, K = W.shape

    # --- Lane packing: largest divisor G of N with G*K <= 128 (lane-dense). ---
    limit = max(1, 128 // K)
    G = 1
    for d in range(min(limit, N), 0, -1):
        if N % d == 0:
            G = d
            break
    M = N // G
    GK = G * K

    # --- Labels: accept any integer dtype as-is (no extra HBM pass). ----------
    labels = I_gt if jnp.issubdtype(I_gt.dtype, jnp.integer) else I_gt.astype(jnp.int32)

    # Free, metadata-only reshapes (row-major): no transpose, no up-cast.
    W_r = W.reshape(B, M, GK)
    L_r = labels.reshape(B, M, G)

    # --- Tile size & VMEM budget (v7x has only 64 MiB physical VMEM). ---------
    w_item = W_r.dtype.itemsize
    l_item = max(L_r.dtype.itemsize, 1)
    w_lanes = ((GK + 127) // 128) * 128        # W rows lane-pad to a 128 multiple
    l_lanes = 128                              # label rows (G <= 128) lane-pad to 128
    row_bytes = w_lanes * w_item + l_lanes * l_item
    vmem_tile_budget = 40 * 1024 * 1024        # double-buffered tiles stay well < 64 MiB
    rows_budget = max(8, vmem_tile_budget // (2 * row_bytes))
    tile_cap = max(8, (min(max_tile_m, rows_budget) // 8) * 8)   # multiple of 8, never 0
    tile_m = M if M <= tile_cap else tile_cap
    grid_m_total = int(pl.cdiv(M, tile_m))

    # --- Optional reduction split: keeps both v7x TensorCores busy at B == 1. --
    if core_split is None:
        core_split = 2 if (B == 1 and grid_m_total >= 2) else 1
    S = max(1, min(int(core_split), grid_m_total))
    steps_per_split = int(pl.cdiv(grid_m_total, S))
    needs_mask = (S * steps_per_split * tile_m) != M

    # --- Tiny constants (constant block index -> DMA'd once). -----------------
    compute_dtype = jnp.bfloat16 if K <= 256 else jnp.float32   # bf16 exact for labels < 256
    lane = jnp.arange(GK)
    E = (lane[None, :] // K == jnp.arange(G)[:, None]).astype(compute_dtype)   # (G, GK)
    CLS = (lane % K).astype(jnp.float32)[None, :]                              # (1, GK)

    if S == 1:
        def m_block(s, b, m):
            return m
    else:
        last_blk = grid_m_total - 1

        def m_block(s, b, m):
            # Clamp so overflow steps re-read the last valid block (masked to zero).
            return jnp.minimum(s * steps_per_split + m, last_blk)

    kernel = _make_miou_kernel(M, tile_m, steps_per_split, needs_mask, compute_dtype)

    vmem_limit = int(2 * tile_m * row_bytes + 4 * 1024 * 1024)
    vmem_limit = min(max(vmem_limit, 16 * 1024 * 1024), 56 * 1024 * 1024)

    cost = pl.CostEstimate(
        flops=int(6 * B * N * K + 2 * B * N * GK),
        transcendentals=0,
        bytes_accessed=int(W_r.size * w_item + L_r.size * l_item + 2 * S * B * GK * 4),
    )

    dot_p, den_p = pl.pallas_call(
        kernel,
        out_shape=(
            jax.ShapeDtypeStruct((S, B, 1, GK), jnp.float32),
            jax.ShapeDtypeStruct((S, B, 1, GK), jnp.float32),
        ),
        grid=(S, B, steps_per_split),
        in_specs=[
            pl.BlockSpec((G, GK), lambda s, b, m: (0, 0)),                        # E
            pl.BlockSpec((1, GK), lambda s, b, m: (0, 0)),                        # CLS
            pl.BlockSpec((1, tile_m, GK), lambda s, b, m: (b, m_block(s, b, m), 0)),  # W
            pl.BlockSpec((1, tile_m, G), lambda s, b, m: (b, m_block(s, b, m), 0)),   # labels
        ],
        out_specs=[
            pl.BlockSpec((1, 1, 1, GK), lambda s, b, m: (s, b, 0, 0)),
            pl.BlockSpec((1, 1, 1, GK), lambda s, b, m: (s, b, 0, 0)),
        ],
        scratch_shapes=[
            pltpu.VMEM((1, GK), jnp.float32),
            pltpu.VMEM((1, GK), jnp.float32),
        ],
        compiler_params=pltpu.CompilerParams(
            dimension_semantics=("parallel", "parallel", "arbitrary"),
            vmem_limit_bytes=vmem_limit,
        ),
        cost_estimate=cost,
    )(E, CLS, W_r, L_r)

    # Tiny epilogue on (B, GK) data: combine splits, fold G groups -> K, divide.
    dot = dot_p[:, :, 0, :].sum(axis=0).reshape(B, G, K).sum(axis=1)
    den = den_p[:, :, 0, :].sum(axis=0).reshape(B, G, K).sum(axis=1)
    return 1.0 - dot / (den - dot + DIVISION_EPS)


# ----------------------------------------------------------------------------
# Pure-JAX reference (mirrors the torch code) for correctness checking.
# ----------------------------------------------------------------------------
def miou_loss_ref(W, I_gt):
    depth = W.shape[2]
    W_gt = jax.nn.one_hot(I_gt, depth, dtype=jnp.float32)
    Wf = W.astype(jnp.float32)
    dot = jnp.sum(W_gt * Wf, axis=1)
    denom = jnp.sum(W_gt, axis=1) + jnp.sum(Wf, axis=1) - dot
    return 1.0 - dot / (denom + DIVISION_EPS)


if __name__ == "__main__":
    key = jax.random.PRNGKey(0)
    k1, k2, k3, k4, k5, k6 = jax.random.split(key, 6)

    # Case 1: B=2, N=512, K=8 -> fully lane-dense packing (G=16, GK=128), one tile.
    B, N, K = 2, 512, 8
    W1 = jax.nn.softmax(jax.random.normal(k1, (B, N, K), jnp.float32), axis=-1)
    I1 = jax.random.randint(k2, (B, N), 0, K, jnp.int32)
    out1 = jax.block_until_ready(miou_loss(W1, I1))
    ref1 = miou_loss_ref(W1, I1)
    assert out1.shape == (B, K)
    assert jnp.allclose(out1, ref1, rtol=1e-4, atol=1e-5), (out1, ref1)

    # Case 2: N=520, K=6 -> largest-divisor packing (G=20, GK=120) + ragged
    # multi-tile reduction (mask gated to the last tile only).
    B, N, K = 2, 520, 6
    W2 = jax.nn.softmax(jax.random.normal(k3, (B, N, K), jnp.float32), axis=-1)
    I2 = jax.random.randint(k4, (B, N), 0, K, jnp.int32)
    out2 = jax.block_until_ready(miou_loss(W2, I2, max_tile_m=16))
    ref2 = miou_loss_ref(W2, I2)
    assert out2.shape == (B, K)
    assert jnp.allclose(out2, ref2, rtol=1e-4, atol=1e-5), (out2, ref2)

    # Case 3: B=1 -> reduction split across a leading "parallel" axis (keeps both
    # v7x TensorCores busy), plus ragged last tile and overflow-step clamping.
    B, N, K = 1, 600, 10
    W3 = jax.nn.softmax(jax.random.normal(k5, (B, N, K), jnp.float32), axis=-1)
    I3 = jax.random.randint(k6, (B, N), 0, K, jnp.int32)
    out3 = jax.block_until_ready(miou_loss(W3, I3, max_tile_m=16))
    ref3 = miou_loss_ref(W3, I3)
    assert out3.shape == (B, K)
    assert jnp.allclose(out3, ref3, rtol=1e-4, atol=1e-5), (out3, ref3)

    print("KERNEL_OK")
</pallas_src>

<mosaic_0001>
module attributes {stable_mosaic.version = 11 : i64} {
  func.func @kernel(%arg0: i32, %arg1: i32, %arg2: i32, %arg3: memref<16x128xbf16, #tpu.memory_space<vmem>>, %arg4: memref<1x128xf32, #tpu.memory_space<vmem>>, %arg5: memref<1x32x128xf32, #tpu.memory_space<vmem>>, %arg6: memref<1x32x16xi32, #tpu.memory_space<vmem>>, %arg7: memref<1x1x1x128xf32, #tpu.memory_space<vmem>>, %arg8: memref<1x1x1x128xf32, #tpu.memory_space<vmem>>, %arg9: memref<1x128xf32, #tpu.memory_space<vmem>>, %arg10: memref<1x128xf32, #tpu.memory_space<vmem>>) attributes {dimension_semantics = [#tpu.dimension_semantics<parallel>, #tpu.dimension_semantics<parallel>, #tpu.dimension_semantics<arbitrary>], iteration_bounds = array<i64: 1, 2, 1>, scalar_prefetch = 0 : i64, scratch_operands = 2 : i64, tpu.core_type = #tpu.core_type<tc>, window_params = [{pipeline_mode = #tpu.pipeline_mode<synchronous>, transform_indices = @transform_0, window_bounds = array<i64: 16, 128>}, {pipeline_mode = #tpu.pipeline_mode<synchronous>, transform_indices = @transform_1, window_bounds = array<i64: 1, 128>}, {transform_indices = @transform_2, window_bounds = array<i64: 1, 32, 128>}, {transform_indices = @transform_3, window_bounds = array<i64: 1, 32, 16>}, {transform_indices = @transform_4, window_bounds = array<i64: 1, 1, 1, 128>}, {transform_indices = @transform_5, window_bounds = array<i64: 1, 1, 1, 128>}]} {
    %c0_i32 = arith.constant 0 : i32
    %0 = arith.cmpi eq, %arg2, %c0_i32 : i32
    %1 = arith.extui %0 : i1 to i32
    %c0_i32_0 = arith.constant 0 : i32
    %2 = arith.cmpi ne, %1, %c0_i32_0 : i32
    scf.if %2 {
      %cst_22 = arith.constant 0.000000e+00 : f32
      %30 = vector.broadcast %cst_22 : f32 to vector<1x128xf32>
      %c0_23 = arith.constant 0 : index
      %c0_24 = arith.constant 0 : index
      %31 = vector.load %arg9[%c0_23, %c0_24] : memref<1x128xf32, #tpu.memory_space<vmem>>, vector<1x128xf32>
      tpu.vector_store %arg9[%c0_23, %c0_24], %30 {strides = array<i32>} : memref<1x128xf32, #tpu.memory_space<vmem>>, vector<1x128xf32>,
      %cst_25 = arith.constant 0.000000e+00 : f32
      %32 = vector.broadcast %cst_25 : f32 to vector<1x128xf32>
      %c0_26 = arith.constant 0 : index
      %c0_27 = arith.constant 0 : index
      %33 = vector.load %arg10[%c0_26, %c0_27] : memref<1x128xf32, #tpu.memory_space<vmem>>, vector<1x128xf32>
      tpu.vector_store %arg10[%c0_26, %c0_27], %32 {strides = array<i32>} : memref<1x128xf32, #tpu.memory_space<vmem>>, vector<1x128xf32>,
    } else {
    }
    %c0 = arith.constant 0 : index
    %c0_1 = arith.constant 0 : index
    %c0_2 = arith.constant 0 : index
    %3 = vector.load %arg5[%c0, %c0_1, %c0_2] : memref<1x32x128xf32, #tpu.memory_space<vmem>>, vector<1x32x128xf32>
    %4 = vector.shape_cast %3 : vector<1x32x128xf32> to vector<32x128xf32>
    %c0_3 = arith.constant 0 : index
    %c0_4 = arith.constant 0 : index
    %c0_5 = arith.constant 0 : index
    %5 = vector.load %arg6[%c0_3, %c0_4, %c0_5] : memref<1x32x16xi32, #tpu.memory_space<vmem>>, vector<1x32x16xi32>
    %6 = vector.shape_cast %5 : vector<1x32x16xi32> to vector<32x16xi32>
    %7 = arith.sitofp %6 : vector<32x16xi32> to vector<32x16xbf16>
    %c0_6 = arith.constant 0 : index
    %c0_7 = arith.constant 0 : index
    %8 = vector.load %arg3[%c0_6, %c0_7] : memref<16x128xbf16, #tpu.memory_space<vmem>>, vector<16x128xbf16>
    %cst = arith.constant dense<0.000000e+00> : vector<32x128xf32>
    %9 = tpu.matmul %7, %8, %cst {dimension_numbers = #tpu.dot_dimension_numbers<[1], [0], [0], [1], [0, 0, 1, 1], [], []>} : vector<32x16xbf16>, vector<16x128xbf16>, vector<32x128xf32> -> vector<32x128xf32>
    %c0_8 = arith.constant 0 : index
    %c0_9 = arith.constant 0 : index
    %10 = vector.load %arg4[%c0_8, %c0_9] : memref<1x128xf32, #tpu.memory_space<vmem>>, vector<1x128xf32>
    %11 = vector.broadcast %10 : vector<1x128xf32> to vector<32x128xf32>
    %12 = arith.cmpf oeq, %9, %11 : vector<32x128xf32>
    %13 = arith.extui %12 : vector<32x128xi1> to vector<32x128xi32>
    %14 = arith.sitofp %13 : vector<32x128xi32> to vector<32x128xf32>
    %c0_10 = arith.constant 0 : index
    %c0_11 = arith.constant 0 : index
    %15 = vector.load %arg9[%c0_10, %c0_11] : memref<1x128xf32, #tpu.memory_space<vmem>>, vector<1x128xf32>
    %16 = arith.mulf %14, %4 : vector<32x128xf32>
    %cst_12 = arith.constant dense<0.000000e+00> : vector<128xf32>
    %17 = vector.multi_reduction <add>, %16, %cst_12 [0] : vector<32x128xf32> to vector<128xf32>
    %18 = vector.shape_cast %17 : vector<128xf32> to vector<1x128xf32>
    %19 = arith.addf %15, %18 : vector<1x128xf32>
    %c0_13 = arith.constant 0 : index
    %c0_14 = arith.constant 0 : index
    %20 = vector.load %arg9[%c0_13, %c0_14] : memref<1x128xf32, #tpu.memory_space<vmem>>, vector<1x128xf32>
    tpu.vector_store %arg9[%c0_13, %c0_14], %19 {strides = array<i32>} : memref<1x128xf32, #tpu.memory_space<vmem>>, vector<1x128xf32>,
    %c0_15 = arith.constant 0 : index
    %c0_16 = arith.constant 0 : index
    %21 = vector.load %arg10[%c0_15, %c0_16] : memref<1x128xf32, #tpu.memory_space<vmem>>, vector<1x128xf32>
    %22 = arith.addf %14, %4 : vector<32x128xf32>
    %cst_17 = arith.constant dense<0.000000e+00> : vector<128xf32>
    %23 = vector.multi_reduction <add>, %22, %cst_17 [0] : vector<32x128xf32> to vector<128xf32>
    %24 = vector.shape_cast %23 : vector<128xf32> to vector<1x128xf32>
    %25 = arith.addf %21, %24 : vector<1x128xf32>
    %c0_18 = arith.constant 0 : index
    %c0_19 = arith.constant 0 : index
    %26 = vector.load %arg10[%c0_18, %c0_19] : memref<1x128xf32, #tpu.memory_space<vmem>>, vector<1x128xf32>
    tpu.vector_store %arg10[%c0_18, %c0_19], %25 {strides = array<i32>} : memref<1x128xf32, #tpu.memory_space<vmem>>, vector<1x128xf32>,
    %c0_i32_20 = arith.constant 0 : i32
    %27 = arith.cmpi eq, %arg2, %c0_i32_20 : i32
    %28 = arith.extui %27 : i1 to i32
    %c0_i32_21 = arith.constant 0 : i32
    %29 = arith.cmpi ne, %28, %c0_i32_21 : i32
    scf.if %29 {
      %c0_22 = arith.constant 0 : index
      %c0_23 = arith.constant 0 : index
      %30 = vector.load %arg9[%c0_22, %c0_23] : memref<1x128xf32, #tpu.memory_space<vmem>>, vector<1x128xf32>
      %31 = vector.shape_cast %30 : vector<1x128xf32> to vector<1x1x1x128xf32>
      %c0_24 = arith.constant 0 : index
      %c0_25 = arith.constant 0 : index
      %c0_26 = arith.constant 0 : index
      %c0_27 = arith.constant 0 : index
      %32 = vector.load %arg7[%c0_24, %c0_25, %c0_26, %c0_27] : memref<1x1x1x128xf32, #tpu.memory_space<vmem>>, vector<1x1x1x128xf32>
      tpu.vector_store %arg7[%c0_24, %c0_25, %c0_26, %c0_27], %31 {strides = array<i32>} : memref<1x1x1x128xf32, #tpu.memory_space<vmem>>, vector<1x1x1x128xf32>,
      %c0_28 = arith.constant 0 : index
      %c0_29 = arith.constant 0 : index
      %33 = vector.load %arg10[%c0_28, %c0_29] : memref<1x128xf32, #tpu.memory_space<vmem>>, vector<1x128xf32>
      %34 = vector.shape_cast %33 : vector<1x128xf32> to vector<1x1x1x128xf32>
      %c0_30 = arith.constant 0 : index
      %c0_31 = arith.constant 0 : index
      %c0_32 = arith.constant 0 : index
      %c0_33 = arith.constant 0 : index
      %35 = vector.load %arg8[%c0_30, %c0_31, %c0_32, %c0_33] : memref<1x1x1x128xf32, #tpu.memory_space<vmem>>, vector<1x1x1x128xf32>
      tpu.vector_store %arg8[%c0_30, %c0_31, %c0_32, %c0_33], %34 {strides = array<i32>} : memref<1x1x1x128xf32, #tpu.memory_space<vmem>>, vector<1x1x1x128xf32>,
    } else {
    }
    return
  }
  func.func @transform_0(%arg0: i32, %arg1: i32, %arg2: i32) -> (i32, i32) {
    %c0_i32 = arith.constant 0 : i32
    %c0_i32_0 = arith.constant 0 : i32
    %c0_i32_1 = arith.constant 0 : i32
    return %c0_i32, %c0_i32_0 : i32, i32
  }
  func.func @transform_1(%arg0: i32, %arg1: i32, %arg2: i32) -> (i32, i32) {
    %c0_i32 = arith.constant 0 : i32
    %c0_i32_0 = arith.constant 0 : i32
    %c0_i32_1 = arith.constant 0 : i32
    return %c0_i32, %c0_i32_0 : i32, i32
  }
  func.func @transform_2(%arg0: i32, %arg1: i32, %arg2: i32) -> (i32, i32, i32) {
    %c0_i32 = arith.constant 0 : i32
    %c0_i32_0 = arith.constant 0 : i32
    return %arg1, %arg2, %c0_i32 : i32, i32, i32
  }
  func.func @transform_3(%arg0: i32, %arg1: i32, %arg2: i32) -> (i32, i32, i32) {
    %c0_i32 = arith.constant 0 : i32
    %c0_i32_0 = arith.constant 0 : i32
    return %arg1, %arg2, %c0_i32 : i32, i32, i32
  }
  func.func @transform_4(%arg0: i32, %arg1: i32, %arg2: i32) -> (i32, i32, i32, i32) {
    %c0_i32 = arith.constant 0 : i32
    %c0_i32_0 = arith.constant 0 : i32
    %c0_i32_1 = arith.constant 0 : i32
    return %arg0, %arg1, %c0_i32, %c0_i32_0 : i32, i32, i32, i32
  }
  func.func @transform_5(%arg0: i32, %arg1: i32, %arg2: i32) -> (i32, i32, i32, i32) {
    %c0_i32 = arith.constant 0 : i32
    %c0_i32_0 = arith.constant 0 : i32
    %c0_i32_1 = arith.constant 0 : i32
    return %arg0, %arg1, %c0_i32, %c0_i32_0 : i32, i32, i32, i32
  }
}

</mosaic_0001>

<bundles_post_ra>
// kernel: tpu_custom_call.1
= control target key start
LH: loop header
LB: loop body
LE: loop exit
PB: predicated region body
PF: predicated region fallthrough
CT: control target
= control target key end

     0   :  { %11 = vsyncpa [#allocation5], 0  ;;  %s1000_s0 = inlined_call_operand.vmem [shape: bf16[16,128], index: 0, kind: input, shape index: {}]   ;;  %s1001_s1 = inlined_call_operand.vmem [shape: f32[1,128], index: 1, kind: input, shape index: {}]   ;;  %s1002_s2 = inlined_call_operand.vmem [shape: f32[2,32,128], index: 2, kind: input, shape index: {}]   ;;  %s1003_s3 = inlined_call_operand.vmem [shape: s32[2,32,16], index: 3, kind: input, shape index: {}]   ;;  %s1004_s4 = inlined_call_operand.hbm [shape: f32[1,2,1,128], index: 4, kind: output, shape index: {0}]   ;;  %s1005_s5 = inlined_call_operand.hbm [shape: f32[1,2,1,128], index: 5, kind: output, shape index: {1}]  }
   0x1   :  { %13 = vsyncpa [#allocation5 + $0x1], 0 }
   0x2   :  { %14 = vsyncpa [#allocation7], 0 }
   0x3   :  { %16 = vsyncpa [#allocation7 + $0x1], 0  ;;  %s845_s18 = smov 0   ;;  %s847_s19 = smov 0  }
   0x4   :  { %s849_s20 = smov 0   ;;  %s851_s21 = smov 0  }
   0x5   :  { %s853_s22 = smov 0   ;;  %s855_s23 = smov 0  }
   0x6 LB: > { %s606_s24 = sadd.s32 4294967295, %s810_s23   ;;  %s607_s25 = sadd.s32 4294967294, %s810_s23   ;;  %s810_s23 = sphi %s855_s23, %s22_s23   ;;  %s806_s22 = sphi %s853_s22, %s1012_s22   ;;  %s802_s21 = sphi %s851_s21, %s1011_s21   ;;  %s798_s20 = sphi %s849_s20, %s1010_s20   ;;  %s794_s19 = sphi %s847_s19, %s1009_s19   ;;  %s790_s18 = sphi %s845_s18, %s1008_s18  }
   0x7   : > { %s37_s26 = sadd.s32 1, %s806_s22  ;;  %s148_s27 = sadd.s32 1, %s798_s20 }
   0x8   : > { %p39_p0 = scmp.ge.s32.totalorder %s37_s26, 2  ;;  %p158_p1 = scmp.ne.s32.totalorder %s798_s20, %s794_s19 }
   0x9   : > { %p159_p2 = scmp.eq.s32.totalorder %s606_s24, 1  ;;  %p164_p3 = scmp.ne.s32.totalorder %s794_s19, %s790_s18 }
   0xa   : > { %s1014_s26 = smov (%p39_p0, %s37_s26), 0  ;;  %p165_p5 = scmp.eq.s32.totalorder %s607_s25, 1 }
   0xb   : > { %p885_p4 = por %p159_p2, %p158_p1  ;;  %s144_s29 = ssub.s32 %s806_s22, %s1014_s26 }
   0xc   : > { %p610_p6 = scmp.ge.s32.totalorder %s810_s23, 1  ;;  %p146_p7 = scmp.eq.s32.totalorder %s144_s29, 0 }
   0xd   : > { %p892_p8 = por %p165_p5, %p164_p3  ;;  %p243_p9 = scmp.lt.s32.totalorder %s810_s23, 3 }
   0xe   : > { %s898_s6 = scalar_select %p146_p7, %s798_s20, %s148_s27  }
   0xf   : > { %p244_p10 = pnand %p610_p6, %p243_p9 }
  0x10   : > { %v699_v0 = vld [vmem:[%s1000_s0] sm:$0xff] (!%p244_p10)   ;;  %p288_p11 = scmp.lt.s32.totalorder (!%p244_p10), %s802_s21, 1  ;;  %v812_v1 = vmov (!%p244_p10), 0.0   ;;  %vm336_vm0 = vcmask (!%p244_p10), 130048   ;;  %s915_s25 = sand.u32 (!%p244_p10), 1, %s794_s19  }
  0x11   : > { %247 = sbr.rel (%p244_p10) target bundleno = 318 (0x13e), region = 36  ;;  %632 = vmatprep.subr.bf16.mxu0 (!%p244_p10), %v699_v0  ;;  %312 = vst [vmem:[#allocation2] sm:$0x1] (!%p244_p10), %v812_v1  ;;  %313 = vst [vmem:[#allocation3] sm:$0x1] (!%p244_p10), %v812_v1  ;;  %s623_s27 = sshll.u32 (!%p244_p10), %s802_s21, 4 }
  0x12   : > { %633 = vmatpush3.bf16.msra.mxu0 (!%p244_p10), %v699_v0  ;;  %v618_v12 = vld [vmem:[%s1001_s1] ss:$0 sm:$0xff] (!%p244_p10)  ;;  %s280_s29 = scalar_lea.vmem (!%p244_p10), [#allocation4], %s915_s25  ;;  %s286_s8 = scalar_lea.vmem (!%p244_p10), [#allocation6], %s915_s25 }
  0x13   : > { %s469_s7 = sshll.u32 (!%p244_p10), %s280_s29, 4  ;;  %s923_s12 = scalar_lea.hbm (!%p244_p10), %s1004_s4, %s623_s27  ;;  %s925_s7 = int_to_ptr.vmem [resolvable:$true] %s469_s7 }
  0x14   : > { %s451_s15 = scalar_lea.sflag (!%p244_p10), [#allocation5], %s915_s25  ;;  %s813_s17 = smov (!%p244_p10), [#allocation4]  }
  0x15   : > { %s704_s24 = sshll.u32 (!%p244_p10), %s813_s17, 4  ;;  %s705_s24 = int_to_ptr.vmem [resolvable:$false] %s704_s24 }
  0x16   : > { %p707_p1 = scmp.lt.s32.totalorder (!%p244_p10), %s925_s7, %s705_s24 }
  0x18   : > { %s289_s9 = scalar_select %p288_p11, %s802_s21, 1  ;;  %v411_v49 = vld [vmem:[#allocation2] sm:$0x1]  ;;  %v427_v50 = vld [vmem:[#allocation3] sm:$0x1] }
  0x19   : > { %s930_s21 = scalar_lea.hbm %s1005_s5, %s623_s27 }
  0x1a   : > { %s627_s10 = sshll.u32 %s289_s9, 5  ;;  %s484_s9 = sshll.u32 %s286_s8, 4  ;;  %s932_s9 = int_to_ptr.vmem [resolvable:$true] %s484_s9 }
  0x1b   : > { %s305_s13 = scalar_lea.vmem %s1003_s3, %s627_s10  ;;  %s295_s16 = scalar_lea.vmem %s1002_s2, %s627_s10 }
  0x1c   : > { %v318_v2 = vld [vmem:[%s305_s13] sm:$0xff]  ;;  %v319_v3 = vld [vmem:[%s305_s13 + $0x8] sm:$0xff]  ;;  %v320_v4 = vld [vmem:[%s305_s13 + $0x10] sm:$0xff]  ;;  %s706_s10 = scalar_lea.vmem %s705_s24, 32 }
  0x1d   : > { %v322_v5 = vcvt.s32.f32 %v318_v2  ;;  %v323_v6 = vcvt.s32.f32 %v319_v3  ;;  %v321_v7 = vld [vmem:[%s305_s13 + $0x18] sm:$0xff]  ;;  %v324_v8 = vcvt.s32.f32 %v320_v4  ;;  %v316_v13 = vld [vmem:[%s295_s16 + $0x10] sm:$0xff]  ;;  %v314_v15 = vld [vmem:[%s295_s16] sm:$0xff] }
  0x1e   : > { %v325_v9 = vcvt.s32.f32 %v321_v7  ;;  %v317_v18 = vld [vmem:[%s295_s16 + $0x18] sm:$0xff]  ;;  %v315_v23 = vld [vmem:[%s295_s16 + $0x8] sm:$0xff]  ;;  %s700_s16 = scalar_lea.vmem %s925_s7, 16 }
  0x1f   : > { %v326_v10 = vpack.c.bf16 %v323_v6, %v322_v5  ;;  %p701_p12 = scmp.ne.s32.totalorder %s925_s7, %s700_s16  ;;  %p708_p2 = scmp.lt.s32.totalorder %s706_s10, %s700_s16 }
  0x20   : > { %v327_v11 = vpack.c.bf16 %v325_v9, %v324_v8 }
  0x21   : > { %634 = vmatprep.mubr.msk.bf16.mxu0 %vm336_vm0, %v326_v10  ;;  %p702_p13 = pnand %p701_p12, %p885_p4  ;;  %p709_p3 = por %p708_p2, %p707_p1 }
  0x22   : > { %635 = vmatmul.mubr.msk.bf16.vlgmr.msra.gmra.mrb[0].mxu0 %vm336_vm0, %v327_v11 }
  0x23   : > { %p703_p0 = pneg %p702_p13 }
  0x25   : > { %p710_p5 = pnand %p709_p3, %p703_p0 }
  0xf5   : > { %v636_v14 = vpop.f32.mrb[0].mxu0 }
  0xf6   : > { %vm401_vm1 = vcmp.eq.f32.partialorder %v636_v14, %v618_v12  ;;  %v377_v16 = vpop.f32.mrb[1].mxu0 }
  0xf7   : > { %v621_v17 = vsel %vm401_vm1, 1.0, %v812_v1  ;;  %vm399_vm2 = vcmp.eq.f32.partialorder %v377_v16, %v618_v12  ;;  %v637_v19 = vpop.f32.mrb[2].mxu0 }
  0xf8   : > { %v414_v20 = vmul.f32 %v621_v17, %v316_v13  ;;  %v430_v21 = vadd.f32 %v621_v17, %v316_v13  ;;  %v619_v22 = vsel %vm399_vm2, 1.0, %v812_v1  ;;  %vm402_vm3 = vcmp.eq.f32.partialorder %v637_v19, %v618_v12  ;;  %v380_v24 = vpop.f32.mrb[3].mxu0 }
  0xf9   : > { %v412_v25 = vmul.f32 %v619_v22, %v314_v15  ;;  %v428_v26 = vadd.f32 %v619_v22, %v314_v15  ;;  %v622_v27 = vsel %vm402_vm3, 1.0, %v812_v1  ;;  %vm400_vm4 = vcmp.eq.f32.partialorder %v380_v24, %v618_v12 }
  0xfa   : > { %v415_v28 = vmul.f32 %v622_v27, %v317_v18  ;;  %v431_v29 = vadd.f32 %v622_v27, %v317_v18  ;;  %v620_v30 = vsel %vm400_vm4, 1.0, %v812_v1 }
  0xfb   : > { %v413_v31 = vmul.f32 %v620_v30, %v315_v23  ;;  %v429_v32 = vadd.f32 %v620_v30, %v315_v23 }
  0xfd   : > { %v416_v33 = vadd.f32 %v413_v31, %v412_v25  ;;  %v432_v34 = vadd.f32 %v429_v32, %v428_v26 }
  0xff   : > { %v417_v35 = vadd.f32 %v416_v33, %v414_v20  ;;  %v433_v36 = vadd.f32 %v432_v34, %v430_v21 }
 0x101   : > { %v418_v37 = vadd.f32 %v417_v35, %v415_v28  ;;  %v434_v38 = vadd.f32 %v433_v36, %v431_v29 }
 0x103   : > { %v419_v39 = vrot.slane %v418_v37, 4  ;;  %v435_v40 = vrot.slane %v434_v38, 4 }
 0x105   : > { %v420_v41 = vadd.f32 %v419_v39, %v418_v37  ;;  %v436_v42 = vadd.f32 %v435_v40, %v434_v38 }
 0x107   : > { %v421_v43 = vrot.slane %v420_v41, 2  ;;  %v437_v44 = vrot.slane %v436_v42, 2 }
 0x109   : > { %v422_v45 = vadd.f32 %v421_v43, %v420_v41  ;;  %v438_v46 = vadd.f32 %v437_v44, %v436_v42 }
 0x10b   : > { %v423_v47 = vrot.slane %v422_v45, 1  ;;  %v439_v48 = vrot.slane %v438_v46, 1 }
 0x10d   : > { %v424_v51 = vadd.f32 %v423_v47, %v422_v45  ;;  %v440_v52 = vadd.f32 %v439_v48, %v438_v46 }
 0x10f   : > { %v425_v53 = vadd.f32 %v424_v51, %v411_v49  ;;  %v441_v54 = vadd.f32 %v440_v52, %v427_v50 }
 0x111   : > { %426 = vst [vmem:[#allocation2] sm:$0x1] %v425_v53  ;;  %442 = vst [vmem:[#allocation3] sm:$0x1] %v441_v54 }
 0x118   : > { %v446_v55 = vld [vmem:[#allocation2] sm:$0x1]  ;;  %v448_v56 = vld [vmem:[#allocation3] sm:$0x1] }
 0x119   : > { %447 = vst [vmem:[%s280_s29] sm:$0x1] %v446_v55  ;;  %449 = vst [vmem:[%s286_s8] sm:$0x1] %v448_v56 }
 0x11a   : > { %713 = shalt.err (!%p710_p5)
}
 0x11b   : > { %s714_s27 = scalar_lea.hbm %s923_s12, 16  ;;  %s718_s11 = scalar_lea.hbm %s1004_s4, 32 }
 0x11c   : > { %p715_p6 = scmp.ne.s32.totalorder %s923_s12, %s714_s27  ;;  %p719_p10 = scmp.lt.u32.totalorder %s923_s12, %s1004_s4 }
 0x11d   : > { %p720_p11 = scmp.lt.u32.totalorder %s718_s11, %s714_s27  ;;  %p722_p13 = scmp.lt.u32.totalorder %s714_s27, %s923_s12 }
 0x11e   : > { %p716_p7 = pnand %p715_p6, %p885_p4 }
 0x11f   : > { %p721_p12 = por %p720_p11, %p719_p10 }
 0x120   : > { %p717_p9 = pneg %p716_p7 }
 0x121   : > { %p723_p0 = por %p722_p13, %p721_p12 }
 0x123   : > { %p724_p1 = pnand %p723_p0, %p717_p9 }
 0x125   : > { %727 = shalt.err (!%p724_p1)
}
 0x126   : > { %638 = dma.vmem_to_hbm [thread:$0]  (%p885_p4), %s925_s7, 16, %s923_s12, %s451_s15  }
 0x127   : > { %s455_s16 = scalar_lea.sflag [#allocation7], %s915_s25  ;;  %s728_s17 = scalar_lea.vmem %s932_s9, 16 }
 0x128   : > { %p729_p2 = scmp.ne.s32.totalorder %s932_s9, %s728_s17  ;;  %s814_s24 = smov [#allocation6]  }
 0x129   : > { %s732_s10 = sshll.u32 %s814_s24, 4  ;;  %s733_s10 = int_to_ptr.vmem [resolvable:$false] %s732_s10 }
 0x12a   : > { %p730_p3 = pnand %p729_p2, %p885_p4  ;;  %s734_s27 = scalar_lea.vmem %s733_s10, 32 }
 0x12b   : > { %p735_p6 = scmp.lt.s32.totalorder %s932_s9, %s733_s10  ;;  %p736_p7 = scmp.lt.s32.totalorder %s734_s27, %s728_s17 }
 0x12c   : > { %p731_p5 = pneg %p730_p3 }
 0x12d   : > { %p737_p9 = por %p736_p7, %p735_p6 }
 0x12f   : > { %p738_p10 = pnand %p737_p9, %p731_p5 }
 0x131   : > { %741 = shalt.err (!%p738_p10)
}
 0x132   : > { %s742_s25 = scalar_lea.hbm %s930_s21, 16  ;;  %s746_s15 = scalar_lea.hbm %s1005_s5, 32 }
 0x133   : > { %p743_p11 = scmp.ne.s32.totalorder %s930_s21, %s742_s25  ;;  %p747_p0 = scmp.lt.u32.totalorder %s930_s21, %s1005_s5 }
 0x134   : > { %p748_p1 = scmp.lt.u32.totalorder %s746_s15, %s742_s25  ;;  %p750_p3 = scmp.lt.u32.totalorder %s742_s25, %s930_s21 }
 0x135   : > { %p744_p12 = pnand %p743_p11, %p885_p4 }
 0x136   : > { %p749_p2 = por %p748_p1, %p747_p0 }
 0x137   : > { %p745_p13 = pneg %p744_p12 }
 0x138   : > { %p751_p5 = por %p750_p3, %p749_p2 }
 0x13a   : > { %p752_p6 = pnand %p751_p5, %p745_p13 }
 0x13c   : > { %755 = shalt.err (!%p752_p6)
}
 0x13d   : > { %639 = dma.vmem_to_hbm [thread:$0]  (%p885_p4), %s932_s9, 16, %s930_s21, %s455_s16  }
 0x13e PF: > { %p649_p7 = scmp.ge.s32.totalorder %s810_s23, 2  ;;  %s496_s11 = sand.u32 1, %s790_s18  }
 0x13f   : > { %s497_s13 = scalar_lea.sflag [#allocation5], %s496_s11 }
 0x140   : > { %p643_p9 = pnand %p649_p7, %p892_p8 }
 0x142   : > { %781 = dma.done.wait (!%p643_p9), %s497_s13, 16  }
 0x143   : > { %783 = vsyncadd (!%p643_p9), %s497_s13, 4294967280  ;;  %s505_s14 = scalar_lea.sflag [#allocation7], %s496_s11 }
 0x144   : > { %785 = dma.done.wait (!%p643_p9), %s505_s14, 16  }
 0x145   : > { %787 = vsyncadd (!%p643_p9), %s505_s14, 4294967280  ;;  %s22_s23 = sadd.s32 1, %s810_s23   ;;  %s1008_s18 = smov %s794_s19 }
 0x146   : > { %p19_p10 = scmp.ge.s32.totalorder %s22_s23, 4   ;;  %s1009_s19 = smov %s798_s20 }
 0x147   : > { %s1010_s20 = smov %s898_s6  ;;  %s1011_s21 = smov %s806_s22 }
 0x148   : > { %s1012_s22 = smov %s1014_s26  ;;  %21 = sbr.rel (!%p19_p10) target bundleno = 6 (0x6), region = 99 }
 0x14f   :  { %509 = vsyncpa [#allocation5], 1 }
 0x150   :  { %511 = vsyncpa [#allocation5 + $0x1], 1 }
 0x151   :  { %512 = vsyncpa [#allocation7], 1 }
 0x152   :  { %514 = vsyncpa [#allocation7 + $0x1], 1 }

</bundles_post_ra>
